<compile_context>
chip_gen: v5e
topology: v5e:2x2
jax: 0.10.0
libtpu: 0.0.40
codegen_flags: <defaults>
</compile_context>

<pallas_src>
import jax
import jax.numpy as jnp
from jax.experimental import pallas as pl
from jax.experimental.pallas import tpu as pltpu

_SPLIT_MIN_BATCH = 1024   # above this, split a single full-batch block in two
                          # so megacore ("parallel") sharding has >= 2 steps.


def _sublane_pack(dtype):
    itemsize = jnp.dtype(dtype).itemsize
    if itemsize >= 4:
        return 8
    if itemsize == 2:
        return 16
    return 32


def _pick_batch_tile(batch, block_batch, pack):
    """Batch tile: multiple of the sublane pack, or the full batch dim."""
    block_batch = max(pack, (block_batch // pack) * pack)
    if batch > block_batch:
        return block_batch
    if batch >= _SPLIT_MIN_BATCH:
        # Two grid steps instead of one so both v7x TensorCores get work.
        half = -(-batch // 2)
        return -(-half // pack) * pack
    # A block equal to the full array dim is always a legal block shape.
    return batch


def _mlp_kernel(x_ref, w1_ref, b1_ref, w2_ref, b2_ref, o_ref):
    # fc1 on the MXU with K = board*board (64); f32 accumulation.
    h = jnp.dot(x_ref[...], w1_ref[...], preferred_element_type=jnp.float32)
    # Bias + ReLU in f32 on the VPU (free filler under the MXU).
    h = jnp.maximum(h + b1_ref[...], 0.0)
    # fc2: cast the activation to the weight dtype (no-op for f32, bf16 on a
    # bf16-weight path), accumulate in f32.
    y = jnp.dot(h.astype(w2_ref.dtype), w2_ref[...],
                preferred_element_type=jnp.float32)
    y = y + b2_ref[...]
    o_ref[...] = y.astype(o_ref.dtype)


def rollout_policy_net(x, w1, b1, w2, b2, *, block_batch=2048):
    """Fused MLP forward.

    x : (batch, board*board)
    w1: (board*board, 256), b1: (256,)
    w2: (256, board*board), b2: (board*board,)
    Returns (batch, board*board) logits in x.dtype.

    block_batch: batch rows per grid step.  2048 amortizes per-step overhead
        on every generation; 4096 is also comfortable on v7x (a tile is only
        a few MiB of VMEM).  Pass bf16 arrays directly if the data already
        lives in bf16 -- the wrapper never casts or pads.
    """
    batch, in_feat = x.shape
    in_feat_w, hidden = w1.shape
    hidden_w, out_feat = w2.shape
    assert in_feat_w == in_feat and hidden_w == hidden
    assert b1.shape == (hidden,) and b2.shape == (out_feat,)

    out_dtype = x.dtype
    pack = max(_sublane_pack(x.dtype), _sublane_pack(w1.dtype))
    tb = _pick_batch_tile(batch, block_batch, pack)
    num_blocks = pl.cdiv(batch, tb)

    # Biases as (1, N) rows so they broadcast against the (tb, N) tiles.
    b1r = b1.reshape(1, hidden)
    b2r = b2.reshape(1, out_feat)

    # Only raise the scoped-VMEM limit when a huge tile actually needs it
    # (relevant on v5e whose default scoped VMEM is 16 MiB).
    itemsize_x = jnp.dtype(x.dtype).itemsize
    itemsize_w = jnp.dtype(w1.dtype).itemsize
    vmem_est = (2 * tb * in_feat * itemsize_x          # double-buffered x tiles
                + 2 * tb * out_feat * itemsize_x       # double-buffered out tiles
                + 2 * tb * hidden * 4                  # f32 h / y intermediates
                + 2 * (in_feat * hidden + hidden * out_feat) * itemsize_w
                + 2 * (hidden + out_feat) * 4)
    vmem_limit = None
    if vmem_est > 12 * (1 << 20):
        vmem_limit = min(int(vmem_est * 1.25) + (1 << 20), 64 * (1 << 20))

    return pl.pallas_call(
        _mlp_kernel,
        out_shape=jax.ShapeDtypeStruct((batch, out_feat), out_dtype),
        grid=(num_blocks,),
        in_specs=[
            # Activations: tiled over batch, pipelined across grid steps.
            # Last block may be partial; OOB rows are dropped on store.
            pl.BlockSpec((tb, in_feat), lambda i: (i, 0)),
            # Weights / biases: constant block index -> DMA'd once, resident.
            pl.BlockSpec((in_feat, hidden), lambda i: (0, 0)),
            pl.BlockSpec((1, hidden), lambda i: (0, 0)),
            pl.BlockSpec((hidden, out_feat), lambda i: (0, 0)),
            pl.BlockSpec((1, out_feat), lambda i: (0, 0)),
        ],
        out_specs=pl.BlockSpec((tb, out_feat), lambda i: (i, 0)),
        compiler_params=pltpu.CompilerParams(
            # Batch axis is embarrassingly parallel -> megacore shard on v7x.
            dimension_semantics=("parallel",),
            vmem_limit_bytes=vmem_limit,
        ),
    )(x, w1, b1r, w2, b2r)


def init_params(key, board_size, hidden=256, dtype=jnp.float32):
    """Deterministic synthetic init (uniform, torch-Linear-like bounds)."""
    n = board_size * board_size
    k1, k2, k3, k4 = jax.random.split(key, 4)
    bound1 = 1.0 / jnp.sqrt(n)
    bound2 = 1.0 / jnp.sqrt(hidden)
    w1 = jax.random.uniform(k1, (n, hidden), dtype, -bound1, bound1)
    b1 = jax.random.uniform(k2, (hidden,), dtype, -bound1, bound1)
    w2 = jax.random.uniform(k3, (hidden, n), dtype, -bound2, bound2)
    b2 = jax.random.uniform(k4, (n,), dtype, -bound2, bound2)
    return w1, b1, w2, b2


if __name__ == "__main__":
    board_size = 8          # -> in/out features = 64, hidden = 256
    n = board_size * board_size

    key = jax.random.PRNGKey(0)
    kx, kp, kx2 = jax.random.split(key, 3)
    w1, b1, w2, b2 = init_params(kp, board_size)

    # 1) Tiny-batch demo shape: single full-dim block, grid=(1,).
    batch = 2
    x = jax.random.normal(kx, (batch, n), jnp.float32)
    ref = jnp.maximum(x @ w1 + b1, 0.0) @ w2 + b2
    out = jax.block_until_ready(rollout_policy_net(x, w1, b1, w2, b2))
    assert out.shape == (batch, n)
    assert jnp.allclose(out, ref, atol=1e-5, rtol=1e-5)

    # 2) Uneven multi-block sanity check: exercises the pipelined grid and
    #    the partial last block (37 rows, 16-row tiles -> 3 steps, last = 5).
    batch2 = 37
    x2 = jax.random.normal(kx2, (batch2, n), jnp.float32)
    ref2 = jnp.maximum(x2 @ w1 + b1, 0.0) @ w2 + b2
    out2 = jax.block_until_ready(
        rollout_policy_net(x2, w1, b1, w2, b2, block_batch=16))
    assert out2.shape == (batch2, n)
    assert jnp.allclose(out2, ref2, atol=1e-5, rtol=1e-5)

    print("KERNEL_OK")
</pallas_src>

<mosaic_0001>
module attributes {stable_mosaic.version = 11 : i64} {
  func.func @_mlp_kernel(%arg0: i32, %arg1: memref<2x64xf32, #tpu.memory_space<vmem>>, %arg2: memref<64x256xf32, #tpu.memory_space<vmem>>, %arg3: memref<1x256xf32, #tpu.memory_space<vmem>>, %arg4: memref<256x64xf32, #tpu.memory_space<vmem>>, %arg5: memref<1x64xf32, #tpu.memory_space<vmem>>, %arg6: memref<2x64xf32, #tpu.memory_space<vmem>>) attributes {dimension_semantics = [#tpu.dimension_semantics<parallel>], iteration_bounds = array<i64: 1>, scalar_prefetch = 0 : i64, scratch_operands = 0 : i64, tpu.core_type = #tpu.core_type<tc>, window_params = [{transform_indices = @transform_0, window_bounds = array<i64: 2, 64>}, {pipeline_mode = #tpu.pipeline_mode<synchronous>, transform_indices = @transform_1, window_bounds = array<i64: 64, 256>}, {pipeline_mode = #tpu.pipeline_mode<synchronous>, transform_indices = @transform_2, window_bounds = array<i64: 1, 256>}, {pipeline_mode = #tpu.pipeline_mode<synchronous>, transform_indices = @transform_3, window_bounds = array<i64: 256, 64>}, {pipeline_mode = #tpu.pipeline_mode<synchronous>, transform_indices = @transform_4, window_bounds = array<i64: 1, 64>}, {transform_indices = @transform_5, window_bounds = array<i64: 2, 64>}]} {
    %c0 = arith.constant 0 : index
    %c0_0 = arith.constant 0 : index
    %0 = vector.load %arg1[%c0, %c0_0] : memref<2x64xf32, #tpu.memory_space<vmem>>, vector<2x64xf32>
    %c0_1 = arith.constant 0 : index
    %c0_2 = arith.constant 0 : index
    %1 = vector.load %arg2[%c0_1, %c0_2] : memref<64x256xf32, #tpu.memory_space<vmem>>, vector<64x256xf32>
    %cst = arith.constant dense<0.000000e+00> : vector<2x256xf32>
    %2 = tpu.matmul %0, %1, %cst {dimension_numbers = #tpu.dot_dimension_numbers<[1], [0], [0], [1], [0, 0, 1, 1], [], []>} : vector<2x64xf32>, vector<64x256xf32>, vector<2x256xf32> -> vector<2x256xf32>
    %c0_3 = arith.constant 0 : index
    %c0_4 = arith.constant 0 : index
    %3 = vector.load %arg3[%c0_3, %c0_4] : memref<1x256xf32, #tpu.memory_space<vmem>>, vector<1x256xf32>
    %4 = vector.broadcast %3 : vector<1x256xf32> to vector<2x256xf32>
    %5 = arith.addf %2, %4 : vector<2x256xf32>
    %cst_5 = arith.constant 0.000000e+00 : f32
    %6 = vector.broadcast %cst_5 : f32 to vector<2x256xf32>
    %7 = arith.maximumf %5, %6 : vector<2x256xf32>
    %c0_6 = arith.constant 0 : index
    %c0_7 = arith.constant 0 : index
    %8 = vector.load %arg4[%c0_6, %c0_7] : memref<256x64xf32, #tpu.memory_space<vmem>>, vector<256x64xf32>
    %cst_8 = arith.constant dense<0.000000e+00> : vector<2x64xf32>
    %9 = tpu.matmul %7, %8, %cst_8 {dimension_numbers = #tpu.dot_dimension_numbers<[1], [0], [0], [1], [0, 0, 1, 1], [], []>} : vector<2x256xf32>, vector<256x64xf32>, vector<2x64xf32> -> vector<2x64xf32>
    %c0_9 = arith.constant 0 : index
    %c0_10 = arith.constant 0 : index
    %10 = vector.load %arg5[%c0_9, %c0_10] : memref<1x64xf32, #tpu.memory_space<vmem>>, vector<1x64xf32>
    %11 = vector.broadcast %10 : vector<1x64xf32> to vector<2x64xf32>
    %12 = arith.addf %9, %11 : vector<2x64xf32>
    %c0_11 = arith.constant 0 : index
    %c0_12 = arith.constant 0 : index
    %13 = vector.load %arg6[%c0_11, %c0_12] : memref<2x64xf32, #tpu.memory_space<vmem>>, vector<2x64xf32>
    tpu.vector_store %arg6[%c0_11, %c0_12], %12 {strides = array<i32>} : memref<2x64xf32, #tpu.memory_space<vmem>>, vector<2x64xf32>,
    return
  }
  func.func @transform_0(%arg0: i32) -> (i32, i32) {
    %c0_i32 = arith.constant 0 : i32
    %c0_i32_0 = arith.constant 0 : i32
    return %arg0, %c0_i32 : i32, i32
  }
  func.func @transform_1(%arg0: i32) -> (i32, i32) {
    %c0_i32 = arith.constant 0 : i32
    %c0_i32_0 = arith.constant 0 : i32
    %c0_i32_1 = arith.constant 0 : i32
    return %c0_i32, %c0_i32_0 : i32, i32
  }
  func.func @transform_2(%arg0: i32) -> (i32, i32) {
    %c0_i32 = arith.constant 0 : i32
    %c0_i32_0 = arith.constant 0 : i32
    %c0_i32_1 = arith.constant 0 : i32
    return %c0_i32, %c0_i32_0 : i32, i32
  }
  func.func @transform_3(%arg0: i32) -> (i32, i32) {
    %c0_i32 = arith.constant 0 : i32
    %c0_i32_0 = arith.constant 0 : i32
    %c0_i32_1 = arith.constant 0 : i32
    return %c0_i32, %c0_i32_0 : i32, i32
  }
  func.func @transform_4(%arg0: i32) -> (i32, i32) {
    %c0_i32 = arith.constant 0 : i32
    %c0_i32_0 = arith.constant 0 : i32
    %c0_i32_1 = arith.constant 0 : i32
    return %c0_i32, %c0_i32_0 : i32, i32
  }
  func.func @transform_5(%arg0: i32) -> (i32, i32) {
    %c0_i32 = arith.constant 0 : i32
    %c0_i32_0 = arith.constant 0 : i32
    return %arg0, %c0_i32 : i32, i32
  }
}

</mosaic_0001>

<bundles_post_ra>
// kernel: tpu_custom_call.1
= control target key start
LH: loop header
LB: loop body
LE: loop exit
PB: predicated region body
PF: predicated region fallthrough
CT: control target
= control target key end

     0   :  { %vm44_vm0 = vcmask 523264   ;;  %s401_s0 = inlined_call_operand.vmem [shape: f32[2,64], index: 0, kind: input, shape index: {}]   ;;  %s402_s1 = inlined_call_operand.vmem [shape: f32[64,256], index: 1, kind: input, shape index: {}]   ;;  %s403_s2 = inlined_call_operand.vmem [shape: f32[1,256], index: 2, kind: input, shape index: {}]   ;;  %s404_s3 = inlined_call_operand.vmem [shape: f32[256,64], index: 3, kind: input, shape index: {}]   ;;  %s405_s4 = inlined_call_operand.vmem [shape: f32[1,64], index: 4, kind: input, shape index: {}]   ;;  %s406_s5 = inlined_call_operand.hbm [shape: f32[2,64], index: 5, kind: output, shape index: {}]  }
   0x1   :  { %v36_v0 = vld [vmem:[%s402_s1 + $0x70] sm:$0xff]  ;;  %v34_v1 = vld [vmem:[%s402_s1 + $0x60] sm:$0xff]  ;;  %v37_v2 = vld [vmem:[%s402_s1 + $0x78] sm:$0xff] }
   0x2   :  { %56 = vmatpush.msra.mxu0 %v36_v0  ;;  %76 = vmatpush.msra.mxu1 %v37_v2  ;;  %v35_v3 = vld [vmem:[%s402_s1 + $0x68] sm:$0xff]  ;;  %v32_v4 = vld [vmem:[%s402_s1 + $0x50] sm:$0xff]  ;;  %v33_v5 = vld [vmem:[%s402_s1 + $0x58] sm:$0xff] }
   0x3   :  { %v30_v6 = vld [vmem:[%s402_s1 + $0x40] sm:$0xff]  ;;  %v31_v7 = vld [vmem:[%s402_s1 + $0x48] sm:$0xff]  ;;  %v28_v8 = vld [vmem:[%s402_s1 + $0x30] sm:$0xff] }
   0x4   :  { %57 = vmatpush.msra.mxu0 %v34_v1  ;;  %77 = vmatpush.msra.mxu1 %v35_v3  ;;  %v105_v9 = vld [vmem:[%s404_s3 + $0x78] sm:$0xff]  ;;  %v104_v11 = vld [vmem:[%s404_s3 + $0x70] sm:$0xff]  ;;  %v103_v13 = vld [vmem:[%s404_s3 + $0x68] sm:$0xff] }
   0x5   :  { %v29_v10 = vld [vmem:[%s402_s1 + $0x38] sm:$0xff]  ;;  %126 = vmatpush.msra.mxu2 %v105_v9  ;;  %v120_v14 = vld [vmem:[%s404_s3 + $0xf0] sm:$0xff]  ;;  %v26_v15 = vld [vmem:[%s402_s1 + $0x20] sm:$0xff] }
   0x6   :  { %58 = vmatpush.msra.mxu0 %v32_v4  ;;  %78 = vmatpush.msra.mxu1 %v33_v5  ;;  %v121_v12 = vld [vmem:[%s404_s3 + $0xf8] sm:$0xff]  ;;  %v27_v16 = vld [vmem:[%s402_s1 + $0x28] sm:$0xff]  ;;  %v102_v17 = vld [vmem:[%s404_s3 + $0x60] sm:$0xff] }
   0x7   :  { %127 = vmatpush.msra.mxu2 %v104_v11  ;;  %146 = vmatpush.msra.mxu3 %v121_v12  ;;  %v119_v18 = vld [vmem:[%s404_s3 + $0xe8] sm:$0xff]  ;;  %v24_v19 = vld [vmem:[%s402_s1 + $0x10] sm:$0xff]  ;;  %v25_v20 = vld [vmem:[%s402_s1 + $0x18] sm:$0xff] }
   0x8   :  { %59 = vmatpush.msra.mxu0 %v30_v6  ;;  %79 = vmatpush.msra.mxu1 %v31_v7  ;;  %v101_v21 = vld [vmem:[%s404_s3 + $0x58] sm:$0xff]  ;;  %v118_v22 = vld [vmem:[%s404_s3 + $0xe0] sm:$0xff]  ;;  %v23_v24 = vld [vmem:[%s402_s1 + $0x8] sm:$0xff] }
   0x9   :  { %128 = vmatpush.msra.mxu2 %v103_v13  ;;  %147 = vmatpush.msra.mxu3 %v120_v14  ;;  %v22_v23 = vld [vmem:[%s402_s1] sm:$0xff]  ;;  %v100_v26 = vld [vmem:[%s404_s3 + $0x50] sm:$0xff]  ;;  %v117_v27 = vld [vmem:[%s404_s3 + $0xd8] sm:$0xff] }
   0xa   :  { %60 = vmatpush.msra.mxu0 %v28_v8  ;;  %80 = vmatpush.msra.mxu1 %v29_v10  ;;  %v21_v25 = vld [vmem:[%s401_s0] sm:$0x3] }
   0xb   :  { %129 = vmatpush.msra.mxu2 %v102_v17  ;;  %148 = vmatpush.msra.mxu3 %v119_v18 }
   0xc   :  { %61 = vmatpush.msra.mxu0 %v26_v15  ;;  %81 = vmatpush.msra.mxu1 %v27_v16 }
   0xd   :  { %130 = vmatpush.msra.mxu2 %v101_v21  ;;  %149 = vmatpush.msra.mxu3 %v118_v22 }
   0xe   :  { %62 = vmatpush.msra.mxu0 %v24_v19  ;;  %82 = vmatpush.msra.mxu1 %v25_v20 }
   0xf   :  { %10 = vsyncpa [#allocation3], 0  ;;  %v99_v28 = vld [vmem:[%s404_s3 + $0x48] sm:$0xff]  ;;  %v116_v29 = vld [vmem:[%s404_s3 + $0xd0] sm:$0xff]  ;;  %131 = vmatpush.msra.mxu2 %v100_v26  ;;  %150 = vmatpush.msra.mxu3 %v117_v27  ;;  %s175_s18 = sshll.u32 %s406_s5, 4  ;;  %vm166_vm1 = vcmask 517120   ;;  %s176_s18 = int_to_ptr.hbm [resolvable:$true] %s175_s18 }
  0x10   :  { %63 = vmatpush.msra.mxu0 %v22_v23  ;;  %83 = vmatpush.msra.mxu1 %v23_v24  ;;  %v98_v30 = vld [vmem:[%s404_s3 + $0x40] sm:$0xff]  ;;  %v115_v31 = vld [vmem:[%s404_s3 + $0xc8] sm:$0xff]  ;;  %v97_v32 = vld [vmem:[%s404_s3 + $0x38] sm:$0xff] }
  0x11   :  { %184 = vmatmul.msk.f32.vlgmr.msra.gmra.mxu0 %vm44_vm0, %v21_v25  ;;  %185 = vmatmul.msk.f32.vlgmr.msra.gmra.mxu1 %vm44_vm0, %v21_v25  ;;  %v114_v33 = vld [vmem:[%s404_s3 + $0xc0] sm:$0xff]  ;;  %v96_v34 = vld [vmem:[%s404_s3 + $0x30] sm:$0xff]  ;;  %v113_v35 = vld [vmem:[%s404_s3 + $0xb8] sm:$0xff] }
  0x12   :  { %132 = vmatpush.msra.mxu2 %v99_v28  ;;  %151 = vmatpush.msra.mxu3 %v116_v29  ;;  %v95_v36 = vld [vmem:[%s404_s3 + $0x28] sm:$0xff]  ;;  %v112_v37 = vld [vmem:[%s404_s3 + $0xb0] sm:$0xff]  ;;  %v94_v38 = vld [vmem:[%s404_s3 + $0x20] sm:$0xff] }
  0x13   :  { %v111_v39 = vld [vmem:[%s404_s3 + $0xa8] sm:$0xff]  ;;  %v93_v40 = vld [vmem:[%s404_s3 + $0x18] sm:$0xff]  ;;  %v110_v41 = vld [vmem:[%s404_s3 + $0xa0] sm:$0xff] }
  0x14   :  { %133 = vmatpush.msra.mxu2 %v98_v30  ;;  %152 = vmatpush.msra.mxu3 %v115_v31  ;;  %v92_v42 = vld [vmem:[%s404_s3 + $0x10] sm:$0xff]  ;;  %v109_v43 = vld [vmem:[%s404_s3 + $0x98] sm:$0xff]  ;;  %v91_v44 = vld [vmem:[%s404_s3 + $0x8] sm:$0xff] }
  0x15   :  { %v108_v45 = vld [vmem:[%s404_s3 + $0x90] sm:$0xff]  ;;  %v90_v46 = vld [vmem:[%s404_s3] sm:$0xff]  ;;  %v107_v47 = vld [vmem:[%s404_s3 + $0x88] sm:$0xff] }
  0x16   :  { %134 = vmatpush.msra.mxu2 %v97_v32  ;;  %153 = vmatpush.msra.mxu3 %v114_v33  ;;  %v106_v48 = vld [vmem:[%s404_s3 + $0x80] sm:$0xff]  ;;  %s214_s3 = smov [#allocation2]  }
  0x17   :  { %v38_v49 = vld [vmem:[%s403_s2] sm:$0x3]  ;;  %s173_s16 = sshll.u32 %s214_s3, 4  ;;  %s174_s16 = int_to_ptr.vmem [resolvable:$true] %s173_s16 }
  0x18   :  { %135 = vmatpush.msra.mxu2 %v96_v34  ;;  %154 = vmatpush.msra.mxu3 %v113_v35  ;;  %v40_v50 = vperm.slane %v38_v49, 0  ;;  %v41_v51 = vperm.slane %v38_v49, 1  ;;  %v187_v58 = vld [vmem:[%s405_s4] ss:$0 sm:$0xff] }
  0x1a   :  { %136 = vmatpush.msra.mxu2 %v95_v36  ;;  %155 = vmatpush.msra.mxu3 %v112_v37 }
  0x1c   :  { %137 = vmatpush.msra.mxu2 %v94_v38  ;;  %156 = vmatpush.msra.mxu3 %v111_v39 }
  0x1e   :  { %138 = vmatpush.msra.mxu2 %v93_v40  ;;  %157 = vmatpush.msra.mxu3 %v110_v41 }
  0x20   :  { %139 = vmatpush.msra.mxu2 %v92_v42  ;;  %158 = vmatpush.msra.mxu3 %v109_v43 }
  0x22   :  { %140 = vmatpush.msra.mxu2 %v91_v44  ;;  %159 = vmatpush.msra.mxu3 %v108_v45 }
  0x24   :  { %141 = vmatpush.msra.mxu2 %v90_v46  ;;  %160 = vmatpush.msra.mxu3 %v107_v47 }
  0x26   :  { %161 = vmatpush.msra.mxu3 %v106_v48 }
  0x8e   :  { %v65_v52 = vpop.f32.mrf.mxu0  ;;  %v85_v53 = vpop.f32.mrf.mxu1 }
  0x8f   :  { %v66_v54 = vadd.f32 %v65_v52, %v40_v50  ;;  %v86_v55 = vadd.f32 %v85_v53, %v41_v51 }
  0x91   :  { %v88_v56 = vmax.f32 %v66_v54, 0.0  ;;  %v89_v57 = vmax.f32 %v86_v55, 0.0 }
  0x93   :  { %142 = vmatmul.f32.vlgmr.msra.gmra.mxu2 %v88_v56  ;;  %162 = vmatmul.f32.vlgmr.msra.gmra.mxu3 %v89_v57 }
 0x116   :  { %v143_v59 = vpop.f32.mrf.mxu2  ;;  %v163_v60 = vpop.f32.mrf.mxu3 }
 0x117   :  { %v144_v61 = vadd.f32 %v187_v58, %v143_v59 }
 0x119   :  { %v164_v62 = vadd.f32 %v163_v60, %v144_v61 }
 0x11b   :  { %167 = vst.msk [vmem:[#allocation2] sm:$0x3] %vm166_vm1, %v164_v62 }
 0x11c   :  { %178 = dma.vmem_to_hbm [thread:$0]  %s174_s16, 32, %s176_s18, [#allocation3]  }
 0x11d   :  { %212 = dma.done.wait [#allocation3], 32  }
 0x11e   :  { %213 = vsyncadd [#allocation3], 4294967264 }
 0x11f   :  { %183 = vsyncpa [#allocation3], 1 }

</bundles_post_ra>
